<compile_context>
chip_gen: v7x
topology: tpu7x:2x2x1
jax: 0.10.0
libtpu: 0.0.40
codegen_flags: <defaults>
</compile_context>

<pallas_src>
import functools

import jax
import jax.numpy as jnp
from jax import lax
from jax.experimental import pallas as pl
from jax.experimental.pallas import tpu as pltpu

EPS = 1e-8            # F.cosine_similarity eps (each norm clamped separately)
EPS2 = EPS * EPS      # clamp on the squared norms (equivalent under sqrt)


def bnet_kernel(x_ref, w_ref, b_ref, seg_ref, ctx_ref, sim_ref, *, C, D):
    """One (tile_n, SHOT*D) row-block -> context (tile_n, D), sim (tile_n, C)."""
    X = x_ref[...]                                   # (tile_n, SHOT*D)
    W = w_ref[...]                                   # (SHOT*D, 3*C*D) fused block-diag convs
    b = b_ref[...]                                   # (1, 3*C*D)
    seg = seg_ref[...]                               # (C*D, C) 0/1 D-segment-sum matrix

    # Single MXU pass for all three convolutions; K = SHOT*D.  HIGHEST keeps
    # full f32 accuracy (extra MXU passes are free — the kernel is HBM-bound).
    Y = jnp.dot(X, W, preferred_element_type=jnp.float32,
                precision=lax.Precision.HIGHEST) + b          # (tile_n, 3*C*D)

    CD = C * D

    # --- context branch: Conv2d(1,C,(SHOT,1)) + MaxPool3d over the C channels ---
    # Channels live in lane groups of width D -> chained VPU maxima over C
    # lane-slices (full sublane density, rides VALU slots).
    ctx = Y[:, 0:D]
    for c in range(1, C):
        ctx = jnp.maximum(ctx, Y[:, c * D:(c + 1) * D])
    ctx_ref[...] = ctx                               # (tile_n, D) sublane-dense store

    # --- cosine-similarity branch: cos(part1, part2) over the D axis ---
    P1 = Y[:, CD:2 * CD]                             # conv over first  SHOT/2 shots
    P2 = Y[:, 2 * CD:3 * CD]                         # conv over second SHOT/2 shots
    # D-segment sums as tiny MXU matmuls against a static 0/1 matrix: no
    # lane-splitting (C, tile_n, D) reshapes / Mosaic relayouts.
    dotp = jnp.dot(P1 * P2, seg, preferred_element_type=jnp.float32,
                   precision=lax.Precision.HIGHEST)  # (tile_n, C)
    s1 = jnp.dot(P1 * P1, seg, preferred_element_type=jnp.float32,
                 precision=lax.Precision.HIGHEST)
    s2 = jnp.dot(P2 * P2, seg, preferred_element_type=jnp.float32,
                 precision=lax.Precision.HIGHEST)
    # max(||p||, eps) == sqrt(max(||p||^2, eps^2)); one EUP rsqrt, no VPU divide.
    inv = lax.rsqrt(jnp.maximum(s1, EPS2) * jnp.maximum(s2, EPS2))
    sim_ref[...] = dotp * inv                        # (tile_n, C)


def _round_up(a, m):
    return ((a + m - 1) // m) * m


def _pick_tile_n(n, cap):
    """Tile of the row (B*S) axis.  Small problems run as one block; large
    ones use the per-generation cap, shrunk so the grid has >= 2 steps (keeps
    both v7x TensorCores fed) while keeping the sublane dim a multiple of 8."""
    n8 = _round_up(n, 8)
    if n8 <= 1024:
        return n8
    return min(cap, _round_up(pl.cdiv(n8, 2), 8))


def bnet_forward(x, wc, bc, ws, bs):
    """x: (B, S, SHOT, D). Returns bound (B*S, D + C) == torch.cat((context, sim), 1)."""
    B, S, shot, D = x.shape
    N = B * S
    C = wc.shape[0]
    half = shot // 2
    SD = shot * D
    CD = C * D

    # ---- free contiguous collapse of x (no HBM transpose) ----
    x2d = x.reshape(N, SD).astype(jnp.float32)

    # ---- block-diagonal expansion of the fused conv weight: (SHOT*D, 3*C*D) ----
    eye_d = jnp.eye(D, dtype=jnp.float32)
    zeros_half = jnp.zeros((C, half), jnp.float32)
    wc_f = wc.astype(jnp.float32)
    ws_f = ws.astype(jnp.float32)
    w_p1 = jnp.concatenate([ws_f, zeros_half], axis=1)   # part1: first half of shots
    w_p2 = jnp.concatenate([zeros_half, ws_f], axis=1)   # part2: second half of shots
    w_exp = jnp.concatenate([jnp.kron(wc_f.T, eye_d),
                             jnp.kron(w_p1.T, eye_d),
                             jnp.kron(w_p2.T, eye_d)], axis=1)        # (SD, 3*CD)
    bc_f = bc.reshape(C).astype(jnp.float32)
    bs_f = bs.reshape(C).astype(jnp.float32)
    b_exp = jnp.concatenate([jnp.repeat(bc_f, D),
                             jnp.repeat(bs_f, D),
                             jnp.repeat(bs_f, D)]).reshape(1, 3 * CD)  # (1, 3*CD)
    # 0/1 segment-sum matrix: seg[c*D + d, c] = 1
    seg = jnp.kron(jnp.eye(C, dtype=jnp.float32), jnp.ones((D, 1), jnp.float32))

    # ---- per-generation tile of the row axis + padding to the grid ----
    try:
        info = pltpu.get_tpu_info()
        vmem_cap = int(getattr(info, "vmem_capacity_bytes", 64 << 20))
    except Exception:
        vmem_cap = 64 << 20
    cap = 8192 if vmem_cap >= (96 << 20) else 4096        # v5e/v6e vs v7x
    tile_n = _pick_tile_n(N, cap)
    padded_n = _round_up(N, tile_n)
    if padded_n != N:
        x2d = jnp.pad(x2d, ((0, padded_n - N), (0, 0)))   # zero rows -> finite garbage, sliced off
    grid = (padded_n // tile_n,)

    kernel = functools.partial(bnet_kernel, C=C, D=D)

    # Advisory cost estimate so XLA schedules around a memory-bound call.
    flops = 2 * padded_n * SD * (3 * CD) + 6 * padded_n * CD * C
    bytes_accessed = 4 * (padded_n * (SD + D + C) + SD * 3 * CD + 3 * CD + CD * C)
    cost = pl.CostEstimate(flops=flops, transcendentals=padded_n * C,
                           bytes_accessed=bytes_accessed)

    ctx_out, sim_out = pl.pallas_call(
        kernel,
        out_shape=(
            jax.ShapeDtypeStruct((padded_n, D), jnp.float32),   # context
            jax.ShapeDtypeStruct((padded_n, C), jnp.float32),   # cosine sim
        ),
        grid_spec=pltpu.PrefetchScalarGridSpec(
            num_scalar_prefetch=0,
            grid=grid,
            in_specs=[
                pl.BlockSpec((tile_n, SD), lambda i: (i, 0)),
                pl.BlockSpec((SD, 3 * CD), lambda i: (0, 0)),
                pl.BlockSpec((1, 3 * CD), lambda i: (0, 0)),
                pl.BlockSpec((CD, C), lambda i: (0, 0)),
            ],
            out_specs=[
                pl.BlockSpec((tile_n, D), lambda i: (i, 0)),
                pl.BlockSpec((tile_n, C), lambda i: (i, 0)),
            ],
        ),
        compiler_params=pltpu.CompilerParams(
            dimension_semantics=("parallel",),   # shard row tiles across TCs (v7x)
            vmem_limit_bytes=(64 << 20) if cap == 8192 else (32 << 20)),
        cost_estimate=cost,
    )(x2d, w_exp, b_exp, seg)

    # ---- torch-ordered assembly in the wrapper (cheap XLA layout work) ----
    return jnp.concatenate([ctx_out[:N], sim_out[:N]], axis=1)    # (N, D + C)


def bnet_reference(x, wc, bc, ws, bs):
    """Pure-JAX reference of the PyTorch forward (for correctness check)."""
    B, S, shot, D = x.shape
    C = wc.shape[0]
    xr = x.reshape(B * S, shot, D)
    y = jnp.einsum("cs,nsd->ncd", wc, xr, precision="highest") + bc.reshape(1, C, 1)
    context = jnp.max(y, axis=1)                     # (N, D)
    half = shot // 2
    p1 = jnp.einsum("cs,nsd->ncd", ws, xr[:, :half], precision="highest") + bs.reshape(1, C, 1)
    p2 = jnp.einsum("cs,nsd->ncd", ws, xr[:, half:], precision="highest") + bs.reshape(1, C, 1)
    dotp = jnp.sum(p1 * p2, axis=2)
    n1 = jnp.sqrt(jnp.sum(p1 * p1, axis=2))
    n2 = jnp.sqrt(jnp.sum(p2 * p2, axis=2))
    sim = dotp / (jnp.maximum(n1, EPS) * jnp.maximum(n2, EPS))    # (N, C)
    return jnp.concatenate([context, sim], axis=1)


if __name__ == "__main__":
    # cfg.shot_num = 8, cfg.model_settings['sim_channel'] = 4
    B, S, SHOT, D, C = 2, 4, 8, 16, 4

    key = jax.random.PRNGKey(0)
    kx, kwc, kbc, kws, kbs = jax.random.split(key, 5)

    x = jax.random.normal(kx, (B, S, SHOT, D), dtype=jnp.float32)
    # Conv2d(1, C, kernel=(SHOT, 1)) weight (C,1,SHOT,1) squeezed -> (C, SHOT)
    wc = jax.random.normal(kwc, (C, SHOT), dtype=jnp.float32) * 0.1
    bc = jax.random.normal(kbc, (C,), dtype=jnp.float32) * 0.1
    # CosineSimilarity Conv2d(1, C, kernel=(SHOT//2, 1)) -> (C, SHOT//2)
    ws = jax.random.normal(kws, (C, SHOT // 2), dtype=jnp.float32) * 0.1
    bs = jax.random.normal(kbs, (C,), dtype=jnp.float32) * 0.1

    out = jax.block_until_ready(bnet_forward(x, wc, bc, ws, bs))
    ref = bnet_reference(x, wc, bc, ws, bs)

    assert out.shape == (B * S, D + C), out.shape
    assert jnp.allclose(out, ref, atol=1e-5, rtol=1e-5), "mismatch vs reference"

    print("KERNEL_OK")
</pallas_src>

<mosaic_0001>
module attributes {stable_mosaic.version = 11 : i64} {
  func.func @bnet_kernel(%arg0: i32, %arg1: memref<8x128xf32, #tpu.memory_space<vmem>>, %arg2: memref<128x192xf32, #tpu.memory_space<vmem>>, %arg3: memref<1x192xf32, #tpu.memory_space<vmem>>, %arg4: memref<64x4xf32, #tpu.memory_space<vmem>>, %arg5: memref<8x16xf32, #tpu.memory_space<vmem>>, %arg6: memref<8x4xf32, #tpu.memory_space<vmem>>) attributes {dimension_semantics = [#tpu.dimension_semantics<parallel>], iteration_bounds = array<i64: 1>, scalar_prefetch = 0 : i64, scratch_operands = 0 : i64, tpu.core_type = #tpu.core_type<tc>, window_params = [{transform_indices = @transform_0, window_bounds = array<i64: 8, 128>}, {pipeline_mode = #tpu.pipeline_mode<synchronous>, transform_indices = @transform_1, window_bounds = array<i64: 128, 192>}, {pipeline_mode = #tpu.pipeline_mode<synchronous>, transform_indices = @transform_2, window_bounds = array<i64: 1, 192>}, {pipeline_mode = #tpu.pipeline_mode<synchronous>, transform_indices = @transform_3, window_bounds = array<i64: 64, 4>}, {transform_indices = @transform_4, window_bounds = array<i64: 8, 16>}, {transform_indices = @transform_5, window_bounds = array<i64: 8, 4>}]} {
    %c0 = arith.constant 0 : index
    %c0_0 = arith.constant 0 : index
    %0 = vector.load %arg1[%c0, %c0_0] : memref<8x128xf32, #tpu.memory_space<vmem>>, vector<8x128xf32>
    %c0_1 = arith.constant 0 : index
    %c0_2 = arith.constant 0 : index
    %1 = vector.load %arg2[%c0_1, %c0_2] : memref<128x192xf32, #tpu.memory_space<vmem>>, vector<128x192xf32>
    %c0_3 = arith.constant 0 : index
    %c0_4 = arith.constant 0 : index
    %2 = vector.load %arg3[%c0_3, %c0_4] : memref<1x192xf32, #tpu.memory_space<vmem>>, vector<1x192xf32>
    %c0_5 = arith.constant 0 : index
    %c0_6 = arith.constant 0 : index
    %3 = vector.load %arg4[%c0_5, %c0_6] : memref<64x4xf32, #tpu.memory_space<vmem>>, vector<64x4xf32>
    %cst = arith.constant dense<0.000000e+00> : vector<8x192xf32>
    %4 = tpu.matmul %0, %1, %cst {dimension_numbers = #tpu.dot_dimension_numbers<[1], [0], [0], [1], [0, 0, 1, 1], [], []>, precision = #tpu.contract_precision<fp32>} : vector<8x128xf32>, vector<128x192xf32>, vector<8x192xf32> -> vector<8x192xf32>
    %5 = vector.broadcast %2 : vector<1x192xf32> to vector<8x192xf32>
    %6 = arith.addf %4, %5 : vector<8x192xf32>
    %7 = vector.extract_strided_slice %6 {offsets = [0, 0], sizes = [8, 16], strides = [1, 1]} : vector<8x192xf32> to vector<8x16xf32>
    %8 = vector.extract_strided_slice %6 {offsets = [0, 16], sizes = [8, 16], strides = [1, 1]} : vector<8x192xf32> to vector<8x16xf32>
    %9 = arith.maximumf %7, %8 : vector<8x16xf32>
    %10 = vector.extract_strided_slice %6 {offsets = [0, 32], sizes = [8, 16], strides = [1, 1]} : vector<8x192xf32> to vector<8x16xf32>
    %11 = arith.maximumf %9, %10 : vector<8x16xf32>
    %12 = vector.extract_strided_slice %6 {offsets = [0, 48], sizes = [8, 16], strides = [1, 1]} : vector<8x192xf32> to vector<8x16xf32>
    %13 = arith.maximumf %11, %12 : vector<8x16xf32>
    %c0_7 = arith.constant 0 : index
    %c0_8 = arith.constant 0 : index
    %14 = vector.load %arg5[%c0_7, %c0_8] : memref<8x16xf32, #tpu.memory_space<vmem>>, vector<8x16xf32>
    tpu.vector_store %arg5[%c0_7, %c0_8], %13 {strides = array<i32>} : memref<8x16xf32, #tpu.memory_space<vmem>>, vector<8x16xf32>,
    %15 = vector.extract_strided_slice %6 {offsets = [0, 64], sizes = [8, 64], strides = [1, 1]} : vector<8x192xf32> to vector<8x64xf32>
    %16 = vector.extract_strided_slice %6 {offsets = [0, 128], sizes = [8, 64], strides = [1, 1]} : vector<8x192xf32> to vector<8x64xf32>
    %17 = arith.mulf %15, %16 : vector<8x64xf32>
    %cst_9 = arith.constant dense<0.000000e+00> : vector<8x4xf32>
    %18 = tpu.matmul %17, %3, %cst_9 {dimension_numbers = #tpu.dot_dimension_numbers<[1], [0], [0], [1], [0, 0, 1, 1], [], []>, precision = #tpu.contract_precision<fp32>} : vector<8x64xf32>, vector<64x4xf32>, vector<8x4xf32> -> vector<8x4xf32>
    %19 = arith.mulf %15, %15 : vector<8x64xf32>
    %cst_10 = arith.constant dense<0.000000e+00> : vector<8x4xf32>
    %20 = tpu.matmul %19, %3, %cst_10 {dimension_numbers = #tpu.dot_dimension_numbers<[1], [0], [0], [1], [0, 0, 1, 1], [], []>, precision = #tpu.contract_precision<fp32>} : vector<8x64xf32>, vector<64x4xf32>, vector<8x4xf32> -> vector<8x4xf32>
    %21 = arith.mulf %16, %16 : vector<8x64xf32>
    %cst_11 = arith.constant dense<0.000000e+00> : vector<8x4xf32>
    %22 = tpu.matmul %21, %3, %cst_11 {dimension_numbers = #tpu.dot_dimension_numbers<[1], [0], [0], [1], [0, 0, 1, 1], [], []>, precision = #tpu.contract_precision<fp32>} : vector<8x64xf32>, vector<64x4xf32>, vector<8x4xf32> -> vector<8x4xf32>
    %cst_12 = arith.constant 1.000000e-16 : f32
    %23 = vector.broadcast %cst_12 : f32 to vector<8x4xf32>
    %24 = arith.maximumf %20, %23 : vector<8x4xf32>
    %cst_13 = arith.constant 1.000000e-16 : f32
    %25 = vector.broadcast %cst_13 : f32 to vector<8x4xf32>
    %26 = arith.maximumf %22, %25 : vector<8x4xf32>
    %27 = arith.mulf %24, %26 : vector<8x4xf32>
    %28 = math.rsqrt %27 : vector<8x4xf32>
    %29 = arith.mulf %18, %28 : vector<8x4xf32>
    %c0_14 = arith.constant 0 : index
    %c0_15 = arith.constant 0 : index
    %30 = vector.load %arg6[%c0_14, %c0_15] : memref<8x4xf32, #tpu.memory_space<vmem>>, vector<8x4xf32>
    tpu.vector_store %arg6[%c0_14, %c0_15], %29 {strides = array<i32>} : memref<8x4xf32, #tpu.memory_space<vmem>>, vector<8x4xf32>,
    return
  }
  func.func @transform_0(%arg0: i32) -> (i32, i32) {
    %c0_i32 = arith.constant 0 : i32
    %c0_i32_0 = arith.constant 0 : i32
    return %arg0, %c0_i32 : i32, i32
  }
  func.func @transform_1(%arg0: i32) -> (i32, i32) {
    %c0_i32 = arith.constant 0 : i32
    %c0_i32_0 = arith.constant 0 : i32
    %c0_i32_1 = arith.constant 0 : i32
    return %c0_i32, %c0_i32_0 : i32, i32
  }
  func.func @transform_2(%arg0: i32) -> (i32, i32) {
    %c0_i32 = arith.constant 0 : i32
    %c0_i32_0 = arith.constant 0 : i32
    %c0_i32_1 = arith.constant 0 : i32
    return %c0_i32, %c0_i32_0 : i32, i32
  }
  func.func @transform_3(%arg0: i32) -> (i32, i32) {
    %c0_i32 = arith.constant 0 : i32
    %c0_i32_0 = arith.constant 0 : i32
    %c0_i32_1 = arith.constant 0 : i32
    return %c0_i32, %c0_i32_0 : i32, i32
  }
  func.func @transform_4(%arg0: i32) -> (i32, i32) {
    %c0_i32 = arith.constant 0 : i32
    %c0_i32_0 = arith.constant 0 : i32
    return %arg0, %c0_i32 : i32, i32
  }
  func.func @transform_5(%arg0: i32) -> (i32, i32) {
    %c0_i32 = arith.constant 0 : i32
    %c0_i32_0 = arith.constant 0 : i32
    return %arg0, %c0_i32 : i32, i32
  }
}

</mosaic_0001>

<bundles_post_ra>
// kernel: tpu_custom_call.1
= control target key start
LH: loop header
LB: loop body
LE: loop exit
PB: predicated region body
PF: predicated region fallthrough
CT: control target
= control target key end

     0   :  { %v4753_v9 = vmov 0.0   ;;  %s4734_s0 = inlined_call_operand.vmem [shape: f32[8,128], index: 0, kind: input, shape index: {}]   ;;  %s4735_s1 = inlined_call_operand.vmem [shape: f32[128,192], index: 1, kind: input, shape index: {}]   ;;  %s4736_s2 = inlined_call_operand.vmem [shape: f32[1,192], index: 2, kind: input, shape index: {}]   ;;  %s4737_s3 = inlined_call_operand.vmem [shape: f32[64,4], index: 3, kind: input, shape index: {}]   ;;  %s4738_s4 = inlined_call_operand.hbm [shape: f32[8,16], index: 4, kind: output, shape index: {0}]   ;;  %s4739_s5 = inlined_call_operand.vmem [shape: f32[8,4], index: 5, kind: output, shape index: {1}]  }
   0x1   :  { %v3628_v0 = vld [vmem:[%s4735_s1 + $0x8] sm:$0xff]  ;;  %v3633_v1 = vld [vmem:[%s4735_s1 + $0x18] sm:$0xff]  ;;  %v3638_v2 = vld [vmem:[%s4735_s1] sm:$0xff]  ;;  %405 = vmatprep.mubr.f32.mxu0 %v4753_v9  ;;  %169 = vmatprep.mubr.f32.mxu1 %v4753_v9 }
   0x2   :  { %v4786_v3 = vand.u32 4294901760, %v3628_v0  ;;  %v4784_v4 = vand.u32 4294901760, %v3633_v1  ;;  %v3645_v5 = vld [vmem:[%s4735_s1 + $0x10] sm:$0xff]  ;;  %v4780_v6 = vand.u32 4294901760, %v3638_v2  ;;  %v3651_v7 = vld [vmem:[%s4735_s1 + $0x28] sm:$0xff]  ;;  %v3656_v8 = vld [vmem:[%s4735_s1 + $0x38] sm:$0xff] }
   0x3   :  { %v4778_v10 = vand.u32 4294901760, %v3645_v5  ;;  %v4777_v11 = vand.u32 4294901760, %v3651_v7  ;;  %v4776_v12 = vand.u32 4294901760, %v3656_v8  ;;  %v3666_v13 = vld [vmem:[%s4735_s1 + $0x20] sm:$0xff]  ;;  %v3671_v14 = vld [vmem:[%s4735_s1 + $0x30] sm:$0xff]  ;;  %v3744_v39 = vld [vmem:[%s4735_s1 + $0x48] sm:$0xff] }
   0x4   :  { %v3676_v15 = vsub.f32 %v3628_v0, %v4786_v3  ;;  %v3681_v16 = vsub.f32 %v3633_v1, %v4784_v4  ;;  %v3686_v17 = vsub.f32 %v3638_v2, %v4780_v6  ;;  %v4773_v18 = vand.u32 4294901760, %v3666_v13  ;;  %v3749_v40 = vld [vmem:[%s4735_s1 + $0x58] sm:$0xff]  ;;  %v3757_v45 = vld [vmem:[%s4735_s1 + $0x40] sm:$0xff]  ;;  %v3765_v50 = vld [vmem:[%s4735_s1 + $0x50] sm:$0xff] }
   0x5   :  { %v3692_v19 = vsub.f32 %v3645_v5, %v4778_v10  ;;  %v3697_v20 = vsub.f32 %v3651_v7, %v4777_v11  ;;  %v3702_v21 = vsub.f32 %v3656_v8, %v4776_v12  ;;  %v4770_v22 = vand.u32 4294901760, %v3671_v14  ;;  %v3770_v51 = vld [vmem:[%s4735_s1 + $0x68] sm:$0xff]  ;;  %v3775_v52 = vld [vmem:[%s4735_s1 + $0x78] sm:$0xff]  ;;  %v3782_v57 = vld [vmem:[%s4735_s1 + $0x60] sm:$0xff] }
   0x6   :  { %v4763_v23 = vand.u32 4294901760, %v3676_v15  ;;  %v4761_v24 = vand.u32 4294901760, %v3681_v16  ;;  %v4760_v25 = vand.u32 4294901760, %v3686_v17  ;;  %v3711_v26 = vsub.f32 %v3666_v13, %v4773_v18  ;;  %4817 = vst [vmem:[#allocation5_spill] sm:$0xff] %v3775_v52  ;;  %4818 = vst [vmem:[#allocation6_spill] sm:$0xff] %v3782_v57 }
   0x7   :  { %v4759_v27 = vand.u32 4294901760, %v3692_v19  ;;  %v4758_v28 = vand.u32 4294901760, %v3697_v20  ;;  %v4755_v29 = vand.u32 4294901760, %v3702_v21  ;;  %v3719_v30 = vsub.f32 %v3671_v14, %v4770_v22 }
   0x8   :  { %v184_v31 = vsub.f32 %v3676_v15, %v4763_v23  ;;  %v196_v32 = vsub.f32 %v3681_v16, %v4761_v24  ;;  %v190_v33 = vsub.f32 %v3686_v17, %v4760_v25  ;;  %v4750_v34 = vand.u32 4294901760, %v3711_v26 }
   0x9   :  { %v202_v35 = vsub.f32 %v3692_v19, %v4759_v27  ;;  %v208_v36 = vsub.f32 %v3697_v20, %v4758_v28  ;;  %v220_v37 = vsub.f32 %v3702_v21, %v4755_v29  ;;  %v4749_v38 = vand.u32 4294901760, %v3719_v30 }
   0xa   :  { %v185_v41 = vand.u32 4294901760, %v184_v31  ;;  %v197_v42 = vand.u32 4294901760, %v196_v32  ;;  %v191_v43 = vand.u32 4294901760, %v190_v33  ;;  %v214_v44 = vsub.f32 %v3711_v26, %v4750_v34 }
   0xb   :  { %v203_v46 = vand.u32 4294901760, %v202_v35  ;;  %v209_v47 = vand.u32 4294901760, %v208_v36  ;;  %v221_v48 = vand.u32 4294901760, %v220_v37  ;;  %v226_v49 = vsub.f32 %v3719_v30, %v4749_v38 }
   0xc   :  { %v3136_v53 = vpack.c.bf16 %v197_v42, %v185_v41  ;;  %v215_v54 = vand.u32 4294901760, %v214_v44  ;;  %v4769_v55 = vand.u32 4294901760, %v3744_v39  ;;  %v4767_v56 = vand.u32 4294901760, %v3749_v40 }
   0xd   :  { %11 = vsyncpa [#allocation3], 0  ;;  %v3138_v58 = vpack.c.bf16 %v203_v46, %v191_v43  ;;  %v3140_v59 = vpack.c.bf16 %v221_v48, %v209_v47  ;;  %v227_v60 = vand.u32 4294901760, %v226_v49  ;;  %v4744_v61 = vand.u32 4294901760, %v3757_v45  ;;  %v3800_v33 = vld [vmem:[%s4735_s1 + $0x70] sm:$0xff]  ;;  %v3964_v18 = vld [vmem:[%s4735_s1 + $0xc8] sm:$0xff] }
   0xe   :  { %3137 = vmatprep.subr.bf16.mxu0 %v3136_v53  ;;  %v3788_v62 = vsub.f32 %v3744_v39, %v4769_v55  ;;  %v3793_v63 = vsub.f32 %v3749_v40, %v4767_v56  ;;  %v4743_v31 = vand.u32 4294901760, %v3765_v50  ;;  %v4742_v32 = vand.u32 4294901760, %v3770_v51  ;;  %4819 = vst [vmem:[#allocation7_spill] sm:$0xff] %v3800_v33  ;;  %4828 = vst [vmem:[#allocation16_spill] sm:$0xff] %v3964_v18  ;;  %v3994_v4 = vld [vmem:[%s4735_s1 + $0xc0] sm:$0xff]  ;;  %s3590_s24 = smov 64  }
   0xf   :  { %3139 = vmatpush1.bf16.msra.mxu0 %v3138_v58  ;;  %v3142_v35 = vpack.c.bf16 %v227_v60, %v215_v54  ;;  %v3805_v36 = vsub.f32 %v3757_v45, %v4744_v61  ;;  %v4740_v37 = vand.u32 4294901760, %v3775_v52  ;;  %v4741_v41 = vand.u32 4294901760, %v3782_v57  ;;  %v3854_v61 = vld [vmem:[%s4735_s1 + $0x88] sm:$0xff]  ;;  %4830 = vst [vmem:[#allocation18_spill] sm:$0xff] %v3994_v4  ;;  %s3592_s25 = smov 80   ;;  %s3593_s26 = smov 96  }
  0x10   :  { %3141 = vmatprep.subr.bf16.mxu0 %v3140_v59  ;;  %v4747_v42 = vand.u32 4294901760, %v3788_v62  ;;  %v4745_v43 = vand.u32 4294901760, %v3793_v63  ;;  %v3814_v44 = vsub.f32 %v3765_v50, %v4743_v31  ;;  %v3819_v46 = vsub.f32 %v3770_v51, %v4742_v32  ;;  %4820 = vst [vmem:[#allocation8_spill] sm:$0xff] %v3854_v61  ;;  %s3594_s27 = smov [#allocation2]  }
  0x11   :  { %v4746_v47 = vand.u32 4294901760, %v3805_v36  ;;  %v3825_v48 = vsub.f32 %v3775_v52, %v4740_v37  ;;  %v4748_v49 = vand.u32 4294901760, %v3800_v33  ;;  %v3831_v53 = vsub.f32 %v3782_v57, %v4741_v41  ;;  %s2588_s28 = sshll.u32 %s3594_s27, 4  ;;  %s2589_s28 = int_to_ptr.vmem [resolvable:$true] %s2588_s28 }
  0x12   :  { %v232_v54 = vsub.f32 %v3788_v62, %v4747_v42  ;;  %v244_v58 = vsub.f32 %v3793_v63, %v4745_v43  ;;  %v4752_v59 = vand.u32 4294901760, %v3814_v44  ;;  %v4751_v60 = vand.u32 4294901760, %v3819_v46  ;;  %s3563_s29 = scalar_lea.vmem %s2589_s28, 128  ;;  %p3568_p1 = scmp.lt.s32.totalorder %s2589_s28, %s2589_s28 }
  0x13   :  { %3143 = vmatpush1.bf16.msra.mxu0 %v3142_v35  ;;  %v238_v37 = vsub.f32 %v3805_v36, %v4746_v47  ;;  %v4756_v41 = vand.u32 4294901760, %v3825_v48  ;;  %v4757_v32 = vand.u32 4294901760, %v3831_v53  ;;  %v3849_v31 = vsub.f32 %v3800_v33, %v4748_v49  ;;  %v3865_v49 = vld [vmem:[%s4735_s1 + $0x98] sm:$0xff]  ;;  %p3564_p0 = scmp.ne.s32.totalorder %s2589_s28, %s3563_s29  ;;  %p3569_p2 = scmp.lt.s32.totalorder %s3563_s29, %s3563_s29 }
  0x14   :  { %v233_v43 = vand.u32 4294901760, %v232_v54  ;;  %v245_v35 = vand.u32 4294901760, %v244_v58  ;;  %v250_v47 = vsub.f32 %v3814_v44, %v4752_v59  ;;  %v256_v42 = vsub.f32 %v3819_v46, %v4751_v60  ;;  %4821 = vst [vmem:[#allocation9_spill] sm:$0xff] %v3865_v49  ;;  %v3877_v60 = vld [vmem:[%s4735_s1 + $0x80] sm:$0xff]  ;;  %v3882_v59 = vld [vmem:[%s4735_s1 + $0x90] sm:$0xff] }
  0x15   :  { %v239_v38 = vand.u32 4294901760, %v238_v37  ;;  %v268_v34 = vsub.f32 %v3825_v48, %v4756_v41  ;;  %v262_v54 = vsub.f32 %v3831_v53, %v4757_v32  ;;  %v4762_v58 = vand.u32 4294901760, %v3849_v31  ;;  %4822 = vst [vmem:[#allocation10_spill] sm:$0xff] %v3877_v60  ;;  %4823 = vst [vmem:[#allocation11_spill] sm:$0xff] %v3882_v59  ;;  %v3888_v32 = vld [vmem:[%s4735_s1 + $0xa8] sm:$0xff]  ;;  %p3570_p3 = por %p3569_p2, %p3568_p1 }
  0x16   :  { %v3144_v37 = vpack.c.bf16 %v245_v35, %v233_v43  ;;  %v251_v9 = vand.u32 4294901760, %v250_v47  ;;  %v257_v29 = vand.u32 4294901760, %v256_v42  ;;  %v4764_v41 = vand.u32 4294901760, %v3854_v61  ;;  %4824 = vst [vmem:[#allocation12_spill] sm:$0xff] %v3888_v32  ;;  %v3897_v43 = vld [vmem:[%s4735_s1 + $0xb8] sm:$0xff] }
  0x17   :  { %v269_v28 = vand.u32 4294901760, %v268_v34  ;;  %v263_v27 = vand.u32 4294901760, %v262_v54  ;;  %v274_v25 = vsub.f32 %v3849_v31, %v4762_v58  ;;  %v4765_v24 = vand.u32 4294901760, %v3865_v49  ;;  %4825 = vst [vmem:[#allocation13_spill] sm:$0xff] %v3897_v43  ;;  %v3909_v54 = vld [vmem:[%s4735_s1 + $0xa0] sm:$0xff]  ;;  %p3571_p4 = pnand %p3570_p3, %p3564_p0 }
  0x18   :  { %3145 = vmatprep.subr.bf16.mxu0 %v3144_v37  ;;  %v3146_v42 = vpack.c.bf16 %v251_v9, %v239_v38  ;;  %v3902_v47 = vsub.f32 %v3854_v61, %v4764_v41  ;;  %v4766_v34 = vand.u32 4294901760, %v3877_v60  ;;  %v4768_v35 = vand.u32 4294901760, %v3882_v59  ;;  %4826 = vst [vmem:[#allocation14_spill] sm:$0xff] %v3909_v54 }
  0x19   :  { %v3148_v58 = vpack.c.bf16 %v269_v28, %v257_v29  ;;  %v275_v23 = vand.u32 4294901760, %v274_v25  ;;  %v3914_v9 = vsub.f32 %v3865_v49, %v4765_v24  ;;  %v4771_v38 = vand.u32 4294901760, %v3888_v32  ;;  %v3932_v29 = vld [vmem:[%s4735_s1 + $0xb0] sm:$0xff] }
  0x1a   :  { %3147 = vmatpush1.bf16.msra.mxu0 %v3146_v42  ;;  %v4772_v37 = vand.u32 4294901760, %v3902_v47  ;;  %v3921_v41 = vsub.f32 %v3877_v60, %v4766_v34  ;;  %v3926_v28 = vsub.f32 %v3882_v59, %v4768_v35  ;;  %v4774_v25 = vand.u32 4294901760, %v3897_v43  ;;  %4827 = vst [vmem:[#allocation15_spill] sm:$0xff] %v3932_v29 }
  0x1b   :  { %3149 = vmatprep.subr.bf16.mxu0 %v3148_v58  ;;  %v3150_v42 = vpack.c.bf16 %v275_v23, %v263_v27  ;;  %v4775_v24 = vand.u32 4294901760, %v3914_v9  ;;  %v3938_v34 = vsub.f32 %v3888_v32, %v4771_v38  ;;  %v4779_v56 = vand.u32 4294901760, %v3909_v54 }
  0x1c   :  { %v280_v35 = vsub.f32 %v3902_v47, %v4772_v37  ;;  %v4782_v55 = vand.u32 4294901760, %v3921_v41  ;;  %v4781_v22 = vand.u32 4294901760, %v3926_v28  ;;  %v3949_v23 = vsub.f32 %v3897_v43, %v4774_v25 }
  0x1d   :  { %v292_v27 = vsub.f32 %v3914_v9, %v4775_v24  ;;  %v4783_v58 = vand.u32 4294901760, %v3938_v34  ;;  %v4785_v38 = vand.u32 4294901760, %v3932_v29  ;;  %v3959_v37 = vsub.f32 %v3909_v54, %v4779_v56 }
  0x1e   :  { %3151 = vmatpush1.bf16.msra.mxu0 %v3150_v42  ;;  %v281_v25 = vand.u32 4294901760, %v280_v35  ;;  %v286_v24 = vsub.f32 %v3921_v41, %v4782_v55  ;;  %v298_v12 = vsub.f32 %v3926_v28, %v4781_v22  ;;  %v4787_v11 = vand.u32 4294901760, %v3949_v23  ;;  %v3985_v42 = vld [vmem:[%s4735_s1 + $0xd8] sm:$0xff] }
  0x1f   :  { %v293_v10 = vand.u32 4294901760, %v292_v27  ;;  %v304_v56 = vsub.f32 %v3938_v34, %v4783_v58  ;;  %v3980_v35 = vsub.f32 %v3932_v29, %v4785_v38  ;;  %4829 = vst [vmem:[#allocation17_spill] sm:$0xff] %v3985_v42  ;;  %v3999_v38 = vld [vmem:[%s4735_s1 + $0xd0] sm:$0xff]  ;;  %v4008_v58 = vld [vmem:[%s4735_s1 + $0xe8] sm:$0xff]  ;;  %v4834_v32 = vand.u32 4294901760, %v3964_v18 }
  0x20   :  { %v287_v22 = vand.u32 4294901760, %v286_v24  ;;  %v299_v55 = vand.u32 4294901760, %v298_v12  ;;  %v316_v27 = vsub.f32 %v3949_v23, %v4787_v11  ;;  %4831 = vst [vmem:[#allocation19_spill] sm:$0xff] %v3999_v38  ;;  %v4832_v12 = vand.u32 4294901760, %v3959_v37  ;;  %4833 = vst [vmem:[#allocation20_spill] sm:$0xff] %v4008_v58 }
  0x21   :  { %v3152_v3 = vpack.c.bf16 %v293_v10, %v281_v25  ;;  %v305_v6 = vand.u32 4294901760, %v304_v56  ;;  %v4792_v11 = vand.u32 4294901760, %v3980_v35  ;;  %v4014_v10 = vsub.f32 %v3964_v18, %v4834_v32  ;;  %v4019_v56 = vld [vmem:[%s4735_s1 + $0xf8] sm:$0xff]  ;;  %v4029_v32 = vld [vmem:[%s4735_s1 + $0xe0] sm:$0xff] }
  0x22   :  { %v310_v24 = vsub.f32 %v3959_v37, %v4832_v12  ;;  %v3154_v29 = vpack.c.bf16 %v299_v55, %v287_v22  ;;  %v317_v54 = vand.u32 4294901760, %v316_v27  ;;  %4835 = vst [vmem:[#allocation21_spill] sm:$0xff] %v4019_v56  ;;  %v4795_v22 = vand.u32 4294901760, %v3994_v4  ;;  %4836 = vst [vmem:[#allocation22_spill] sm:$0xff] %v4029_v32 }
  0x23   :  { %3153 = vmatprep.subr.bf16.mxu0 %v3152_v3  ;;  %v322_v12 = vsub.f32 %v3980_v35, %v4792_v11  ;;  %v4799_v43 = vand.u32 4294901760, %v4014_v10  ;;  %v4837_v3 = vand.u32 4294901760, %v3985_v42  ;;  %v4801_v11 = vand.u32 4294901760, %v4008_v58 }
  0x24   :  { %v311_v25 = vand.u32 4294901760, %v310_v24  ;;  %3155 = vmatpush1.bf16.msra.mxu0 %v3154_v29  ;;  %v3156_v27 = vpack.c.bf16 %v317_v54, %v305_v6  ;;  %v4041_v55 = vsub.f32 %v3994_v4, %v4795_v22  ;;  %v4838_v59 = vand.u32 4294901760, %v3999_v38  ;;  %v4052_v54 = vld [vmem:[%s4735_s1 + $0xf0] sm:$0xff] }
  0x25   :  { %v4035_v24 = vsub.f32 %v3985_v42, %v4837_v3  ;;  %v323_v18 = vand.u32 4294901760, %v322_v12  ;;  %4839 = vst [vmem:[#allocation23_spill] sm:$0xff] %v4052_v54  ;;  %v328_v12 = vsub.f32 %v4014_v10, %v4799_v43  ;;  %v4061_v22 = vsub.f32 %v4008_v58, %v4801_v11 }
  0x26   :  { %v4046_v29 = vsub.f32 %v3999_v38, %v4838_v59  ;;  %3157 = vmatprep.subr.bf16.mxu0 %v3156_v27  ;;  %v4811_v59 = vand.u32 4294901760, %v4029_v32  ;;  %v4804_v38 = vand.u32 4294901760, %v4041_v55  ;;  %v4840_v27 = vand.u32 4294901760, %v4019_v56 }
  0x27   :  { %v4803_v3 = vand.u32 4294901760, %v4035_v24  ;;  %v3158_v6 = vpack.c.bf16 %v323_v18, %v311_v25  ;;  %v329_v43 = vand.u32 4294901760, %v328_v12  ;;  %v4814_v11 = vand.u32 4294901760, %v4061_v22 }
  0x28   :  { %v4807_v4 = vand.u32 4294901760, %v4046_v29  ;;  %v4069_v42 = vsub.f32 %v4019_v56, %v4840_v27  ;;  %v4815_v58 = vand.u32 4294901760, %v4052_v54  ;;  %v334_v18 = vsub.f32 %v4041_v55, %v4804_v38 }
  0x29   :  { %v340_v60 = vsub.f32 %v4035_v24, %v4803_v3  ;;  %3159 = vmatpush1.bf16.msra.mxu0 %v3158_v6  ;;  %v4086_v12 = vsub.f32 %v4029_v32, %v4811_v59  ;;  %v352_v6 = vsub.f32 %v4061_v22, %v4814_v11  ;;  %vm3589_vm0 = vmmov 0  }
  0x2a   :  { %v346_v25 = vsub.f32 %v4046_v29, %v4807_v4  ;;  %v363_v27 = vand.u32 4294901760, %v4069_v42  ;;  %v4094_v38 = vsub.f32 %v4052_v54, %v4815_v58  ;;  %v335_v56 = vand.u32 4294901760, %v334_v18 }
  0x2b   :  { %v341_v3 = vand.u32 4294901760, %v340_v60  ;;  %v357_v61 = vand.u32 4294901760, %v4086_v12  ;;  %v353_v57 = vand.u32 4294901760, %v352_v6  ;;  %v4846_v6 = vand.u32 4294901760, %v3656_v8 }
  0x2c   :  { %v347_v49 = vand.u32 4294901760, %v346_v25  ;;  %v364_v4 = vsub.f32 %v4069_v42, %v363_v27  ;;  %v369_v59 = vand.u32 4294901760, %v4094_v38  ;;  %v4104_v25 = vld [vmem:[%s4734_s0] sm:$0xff]  ;;  %v4852_v8 = vand.u32 4294901760, %v3681_v16 }
  0x2d   :  { %v3160_v33 = vpack.c.bf16 %v341_v3, %v329_v43  ;;  %v358_v52 = vsub.f32 %v4086_v12, %v357_v61  ;;  %v3168_v43 = vpack.c.bf16 %v3681_v16, %v3676_v15  ;;  %v4858_v16 = vand.u32 4294901760, %v3711_v26 }
  0x2e   :  { %v3162_v60 = vpack.c.bf16 %v347_v49, %v335_v56  ;;  %v365_v32 = vand.u32 4294901760, %v364_v4  ;;  %v370_v11 = vsub.f32 %v4094_v38, %v369_v59  ;;  %v4109_v4 = vand.u32 4294901760, %v4104_v25 }
  0x2f   :  { %3161 = vmatprep.subr.bf16.mxu0 %v3160_v33  ;;  %v359_v54 = vand.u32 4294901760, %v358_v52  ;;  %v3170_v33 = vpack.c.bf16 %v3692_v19, %v3686_v17  ;;  %v4841_v52 = vand.u32 4294901760, %v3628_v0  ;;  %v3174_v56 = vpack.c.bf16 %v3719_v30, %v3711_v26  ;;  %v4192_v26 = vld [vmem:[%s4737_s3] sm:$0xff] }
  0x30   :  { %3163 = vmatpush1.bf16.msra.mxu0 %v3162_v60  ;;  %v3164_v58 = vpack.c.bf16 %v365_v32, %v353_v57  ;;  %v371_v18 = vand.u32 4294901760, %v370_v11  ;;  %v4842_v11 = vand.u32 4294901760, %v3633_v1  ;;  %v4843_v32 = vand.u32 4294901760, %v3638_v2 }
  0x31   :  { %v3176_v0 = vpack.c.bf16 %v3793_v63, %v3788_v62  ;;  %v4845_v1 = vand.u32 4294901760, %v3651_v7  ;;  %v4849_v2 = vand.u32 4294901760, %v3744_v39  ;;  %v4851_v7 = vand.u32 4294901760, %v3676_v15 }
  0x32   :  { %3165 = vmatprep.subr.bf16.mxu0 %v3164_v58  ;;  %v3166_v49 = vpack.c.bf16 %v371_v18, %v359_v54  ;;  %v4117_v57 = vpack.c.bf16 %v4842_v11, %v4841_v52  ;;  %v3172_v58 = vpack.c.bf16 %v3702_v21, %v3697_v20  ;;  %v4844_v54 = vand.u32 4294901760, %v3645_v5 }
  0x33   :  { %v4135_v60 = vpack.c.bf16 %v4846_v6, %v4845_v1  ;;  %v4847_v18 = vand.u32 4294901760, %v3666_v13  ;;  %v4850_v5 = vand.u32 4294901760, %v3749_v40  ;;  %v4155_v11 = vpack.c.bf16 %v4852_v8, %v4851_v7 }
  0x34   :  { %3167 = vmatpush1.bf16.msra.mxu0 %v3166_v49  ;;  %v4127_v3 = vpack.c.bf16 %v4844_v54, %v4843_v32  ;;  %3105 = vmatprep.subr.bf16.mxu1 %v4117_v57  ;;  %v4853_v13 = vand.u32 4294901760, %v3686_v17  ;;  %v4855_v39 = vand.u32 4294901760, %v3697_v20  ;;  %v4856_v40 = vand.u32 4294901760, %v3702_v21 }
  0x35   :  { %3169 = vmatprep.subr.bf16.mxu0 %v3168_v43  ;;  %v4848_v43 = vand.u32 4294901760, %v3671_v14  ;;  %v4147_v52 = vpack.c.bf16 %v4850_v5, %v4849_v2  ;;  %v4854_v14 = vand.u32 4294901760, %v3692_v19  ;;  %v4857_v15 = vmov 0.0  }
  0x36   :  { %v4167_v54 = vpack.c.bf16 %v4856_v40, %v4855_v39  ;;  %3107 = vmatpush1.bf16.msra.mxu1 %v4127_v3  ;;  %v4859_v1 = vand.u32 4294901760, %v3719_v30  ;;  %v4860_v19 = vand.u32 4294901760, %v3788_v62  ;;  %v4861_v6 = vand.u32 4294901760, %v3793_v63  ;;  %v4221_v40 = vld [vmem:[%s4737_s3 + $0x8] sm:$0xff] }
  0x37   :  { %v4141_v49 = vpack.c.bf16 %v4848_v43, %v4847_v18  ;;  %407 = vmatmul.mubr.f32.vlgmr.msra.gmra.mrb[0].mxu0 %v4109_v4  ;;  %v4161_v32 = vpack.c.bf16 %v4854_v14, %v4853_v13  ;;  %v4862_v21 = vand.u32 4294901760, %v3805_v36  ;;  %v4863_v18 = vand.u32 4294901760, %v3814_v44  ;;  %3109 = vmatprep.subr.bf16.mxu1 %v4135_v60 }
  0x38   :  { %3171 = vmatpush1.bf16.msra.mxu0 %v3170_v33  ;;  %541 = vmatprep.mubr.f32.mxu0 %v4857_v15  ;;  %v4175_v17 = vpack.c.bf16 %v4859_v1, %v4858_v16  ;;  %v4181_v20 = vpack.c.bf16 %v4861_v6, %v4860_v19  ;;  %v4864_v30 = vand.u32 4294901760, %v3819_v46  ;;  %v4865_v62 = vand.u32 4294901760, %v3825_v48 }
  0x39   :  { %v4187_v43 = vpack.c.bf16 %v4863_v18, %v4862_v21  ;;  %3173 = vmatprep.subr.bf16.mxu0 %v3172_v58  ;;  %v4866_v63 = vand.u32 4294901760, %v3831_v53  ;;  %v4867_v2 = vand.u32 4294901760, %v3849_v31  ;;  %v4868_v7 = vand.u32 4294901760, %v3902_v47 }
  0x3a   :  { %v4198_v33 = vpack.c.bf16 %v4865_v62, %v4864_v30  ;;  %v4869_v8 = vand.u32 4294901760, %v3914_v9  ;;  %v4870_v58 = vand.u32 4294901760, %v3921_v41  ;;  %v4871_v14 = vand.u32 4294901760, %v3926_v28  ;;  %3111 = vmatpush1.bf16.msra.mxu1 %v4141_v49 }
  0x3b   :  { %v4204_v5 = vpack.c.bf16 %v4867_v2, %v4866_v63  ;;  %v4872_v16 = vand.u32 4294901760, %v3938_v34  ;;  %v4873_v1 = vand.u32 4294901760, %v3949_v23  ;;  %v4874_v6 = vand.u32 4294901760, %v3959_v37  ;;  %3113 = vmatprep.subr.bf16.mxu1 %v4147_v52 }
  0x3c   :  { %v4210_v13 = vpack.c.bf16 %v4869_v8, %v4868_v7  ;;  %v4216_v39 = vpack.c.bf16 %v4871_v14, %v4870_v58  ;;  %v4875_v21 = vand.u32 4294901760, %v3980_v35  ;;  %v4876_v30 = vand.u32 4294901760, %v4014_v10  ;;  %3175 = vmatpush1.bf16.msra.mxu0 %v3174_v56 }
  0x3d   :  { %v4227_v19 = vpack.c.bf16 %v4873_v1, %v4872_v16  ;;  %v4877_v62 = vand.u32 4294901760, %v4035_v24  ;;  %v4878_v2 = vand.u32 4294901760, %v4041_v55  ;;  %v4879_v7 = vand.u32 4294901760, %v4046_v29  ;;  %3177 = vmatprep.subr.bf16.mxu0 %v3176_v0 }
  0x3e   :  { %v4233_v18 = vpack.c.bf16 %v4875_v21, %v4874_v6  ;;  %v4880_v58 = vand.u32 4294901760, %v4061_v22  ;;  %v4252_v16 = vpack.c.bf16 %v369_v59, %v357_v61  ;;  %v955_v1 = vand.u32 4294901760, %v4192_v26 }
  0x3f   :  { %v4239_v63 = vpack.c.bf16 %v4877_v62, %v4876_v30  ;;  %v4245_v8 = vpack.c.bf16 %v4879_v7, %v4878_v2  ;;  %v3178_v6 = vpack.c.bf16 %v3814_v44, %v3805_v36  ;;  %v958_v21 = vand.u32 4294901760, %v4221_v40  ;;  %v4884_v36 = vld [vmem:[#allocation5_spill] sm:$0xff] }
  0x40   :  { %v4250_v14 = vpack.c.bf16 %v363_v27, %v4880_v58  ;;  %v3180_v30 = vpack.c.bf16 %v3825_v48, %v3819_v46  ;;  %v4881_v27 = vand.u32 4294901760, %v3757_v45  ;;  %v4882_v61 = vand.u32 4294901760, %v3765_v50  ;;  %v4888_v48 = vld [vmem:[#allocation7_spill] sm:$0xff] }
  0x41   :  { %v4269_v62 = vsub.f32 %v4192_v26, %v955_v1  ;;  %v4883_v56 = vand.u32 4294901760, %v3770_v51  ;;  %v4885_v44 = vand.u32 4294901760, %v4884_v36  ;;  %v4278_v0 = vsub.f32 %v4221_v40, %v958_v21  ;;  %3179 = vmatpush1.bf16.msra.mxu0 %v3178_v6  ;;  %v4886_v51 = vld [vmem:[#allocation6_spill] sm:$0xff]  ;;  %v4890_v40 = vld [vmem:[#allocation8_spill] sm:$0xff] }
  0x42   :  { %v4266_v59 = vpack.c.bf16 %v4882_v61, %v4881_v27  ;;  %v3182_v45 = vpack.c.bf16 %v3849_v31, %v3831_v53  ;;  %3181 = vmatprep.subr.bf16.mxu0 %v3180_v30  ;;  %v3184_v50 = vpack.c.bf16 %v3914_v9, %v3902_v47  ;;  %v4887_v46 = vand.u32 4294901760, %v4886_v51  ;;  %v4892_v27 = vld [vmem:[#allocation9_spill] sm:$0xff]  ;;  %v4894_v47 = vld [vmem:[#allocation10_spill] sm:$0xff]  ;;  %v4896_v30 = vld [vmem:[#allocation11_spill] sm:$0xff] }
  0x43   :  { %v4275_v2 = vpack.c.bf16 %v4885_v44, %v4883_v56  ;;  %v4889_v26 = vand.u32 4294901760, %v4888_v48  ;;  %v4891_v58 = vand.u32 4294901760, %v4890_v40  ;;  %v4893_v61 = vand.u32 4294901760, %v4892_v27  ;;  %v4898_v44 = vld [vmem:[#allocation12_spill] sm:$0xff] }
  0x44   :  { %3115 = vmatpush1.bf16.msra.mxu1 %v4266_v59  ;;  %v3186_v31 = vpack.c.bf16 %v3926_v28, %v3921_v41  ;;  %v3188_v53 = vpack.c.bf16 %v3949_v23, %v3938_v34  ;;  %v4895_v9 = vand.u32 4294901760, %v4894_v47  ;;  %v4897_v56 = vand.u32 4294901760, %v4896_v30  ;;  %v4902_v28 = vld [vmem:[#allocation14_spill] sm:$0xff]  ;;  %v4906_v27 = vld [vmem:[#allocation16_spill] sm:$0xff] }
  0x45   :  { %3117 = vmatprep.subr.bf16.mxu1 %v4275_v2  ;;  %v4290_v7 = vpack.c.bf16 %v4889_v26, %v4887_v46  ;;  %v4296_v6 = vpack.c.bf16 %v4893_v61, %v4891_v58  ;;  %3183 = vmatpush1.bf16.msra.mxu0 %v3182_v45  ;;  %v4899_v51 = vand.u32 4294901760, %v4898_v44  ;;  %v4900_v46 = vld [vmem:[#allocation13_spill] sm:$0xff]  ;;  %v3190_v41 = vpack.c.bf16 %v3980_v35, %v3959_v37  ;;  %v4914_v44 = vld [vmem:[#allocation20_spill] sm:$0xff] }
  0x46   :  { %3185 = vmatprep.subr.bf16.mxu0 %v3184_v50  ;;  %v4308_v36 = vpack.c.bf16 %v4897_v56, %v4895_v9  ;;  %v4901_v48 = vand.u32 4294901760, %v4900_v46  ;;  %v3192_v34 = vpack.c.bf16 %v4035_v24, %v4014_v10  ;;  %v4903_v23 = vand.u32 4294901760, %v4902_v28  ;;  %v4904_v50 = vld [vmem:[#allocation15_spill] sm:$0xff]  ;;  %v4916_v46 = vld [vmem:[#allocation21_spill] sm:$0xff] }
  0x47   :  { %v4905_v26 = vand.u32 4294901760, %v4904_v50  ;;  %v171_v58 = vsub.f32 %v4104_v25, %v4109_v4  ;;  %v4907_v61 = vand.u32 4294901760, %v4906_v27  ;;  %v3194_v35 = vpack.c.bf16 %v4046_v29, %v4041_v55  ;;  %v4910_v25 = vld [vmem:[#allocation18_spill] sm:$0xff]  ;;  %v4912_v9 = vld [vmem:[#allocation19_spill] sm:$0xff] }
  0x48   :  { %3119 = vmatpush1.bf16.msra.mxu1 %v4290_v7  ;;  %v4314_v45 = vpack.c.bf16 %v4901_v48, %v4899_v51  ;;  %v3196_v24 = vpack.c.bf16 %v4069_v42, %v4061_v22  ;;  %v4913_v30 = vand.u32 4294901760, %v4912_v9  ;;  %v4915_v51 = vand.u32 4294901760, %v4914_v44  ;;  %v4918_v42 = vld [vmem:[#allocation22_spill] sm:$0xff] }
  0x49   :  { %3121 = vmatprep.subr.bf16.mxu1 %v4296_v6  ;;  %3187 = vmatpush1.bf16.msra.mxu0 %v3186_v31  ;;  %v4326_v40 = vpack.c.bf16 %v4905_v26, %v4903_v23  ;;  %v4908_v31 = vld [vmem:[#allocation17_spill] sm:$0xff]  ;;  %v172_v10 = vand.u32 4294901760, %v171_v58  ;;  %v4917_v48 = vand.u32 4294901760, %v4916_v46  ;;  %v3198_v29 = vpack.c.bf16 %v4094_v38, %v4086_v12 }
  0x4a   :  { %3189 = vmatprep.subr.bf16.mxu0 %v3188_v53  ;;  %v4909_v47 = vand.u32 4294901760, %v4908_v31  ;;  %v4911_v53 = vand.u32 4294901760, %v4910_v25  ;;  %v4919_v22 = vand.u32 4294901760, %v4918_v42  ;;  %v3588_v26 = vmov 0.0|0.0  }
  0x4b   :  { %v173_v55 = vsub.f32 %v171_v58, %v172_v10  ;;  %v4367_v27 = vpack.c.bf16 %v958_v21, %v955_v1  ;;  %v1040_v38 = vand.u32 4294901760, %v4269_v62  ;;  %v1047_v12 = vand.u32 4294901760, %v4278_v0 }
  0x4c   :  { %3123 = vmatpush1.bf16.msra.mxu1 %v4308_v36  ;;  %v4334_v37 = vpack.c.bf16 %v4909_v47, %v4907_v61  ;;  %v4346_v56 = vpack.c.bf16 %v4913_v30, %v4911_v53  ;;  %vm951_vm1 = vcmask 523264   ;;  %vm941_vm2 = vcmask 130048  }
  0x4d   :  { %3125 = vmatprep.subr.bf16.mxu1 %v4314_v45  ;;  %3191 = vmatpush1.bf16.msra.mxu0 %v3190_v41  ;;  %v4352_v41 = vpack.c.bf16 %v4917_v48, %v4915_v51  ;;  %v174_v50 = vand.u32 4294901760, %v173_v55 }
  0x4e   :  { %3193 = vmatprep.subr.bf16.mxu0 %v3192_v34  ;;  %v4920_v34 = vld [vmem:[#allocation23_spill] sm:$0xff] }
  0x4f   :  { %v4921_v28 = vand.u32 4294901760, %v4920_v34  ;;  %v63_v34 = vlaneseq }
  0x50   :  { %3127 = vmatpush1.bf16.msra.mxu1 %v4326_v40 }
  0x51   :  { %3129 = vmatprep.subr.bf16.mxu1 %v4334_v37  ;;  %3195 = vmatpush1.bf16.msra.mxu0 %v3194_v35  ;;  %v4362_v23 = vpack.c.bf16 %v4921_v28, %v4919_v22  ;;  %v64_v28 = vshrl.u32 %v63_v34, 7 }
  0x52   :  { %3197 = vmatprep.subr.bf16.mxu0 %v3196_v24 }
  0x54   :  { %3131 = vmatpush1.bf16.msra.mxu1 %v4346_v56 }
  0x55   :  { %3133 = vmatprep.subr.bf16.mxu1 %v4352_v41  ;;  %3199 = vmatpush1.bf16.msra.mxu0 %v3198_v29 }
  0x56   :  { %3201 = vmatprep.subr.bf16.mxu0 %v4117_v57 }
  0x58   :  { %3135 = vmatpush1.bf16.msra.mxu1 %v4362_v23  ;;  %544 = vmatmul.mubr.f32.vlgmr.msra.gmra.mrb[0].mxu0 %v171_v58 }
  0x59   :  { %3296 = vmatprep.subr.bf16.mxu1 %v3588_v26  ;;  %3203 = vmatpush1.bf16.msra.mxu0 %v4127_v3 }
  0x5a   :  { %646 = vmatprep.mubr.f32.mxu0 %v4857_v15  ;;  %3205 = vmatprep.subr.bf16.mxu0 %v4135_v60 }
  0x5b   :  { %175 = vmatmul.mubr.f32.vlgmr.msra.gmra.mrb[0].mxu1 %v174_v50  ;;  %v53_v50 = vld [vmem:[%s4736_s2] sm:$0x3]  ;;  %s3591_s2 = smov 112  }
  0x5c   :  { %3298 = vmatpush3.bf16.msra.mxu1 %v4367_v27  ;;  %2778 = vmatprep.mubr.msk.f32.mxu1 %vm3589_vm0, %v4857_v15 }
  0x5d   :  { %3299 = vmatprep.subr.bf16.mxu1 %v3588_v26  ;;  %3207 = vmatpush1.bf16.msra.mxu0 %v4141_v49 }
  0x5e   :  { %3209 = vmatprep.subr.bf16.mxu0 %v4147_v52 }
  0x61   :  { %3211 = vmatpush1.bf16.msra.mxu0 %v4266_v59 }
  0x62   :  { %3213 = vmatprep.subr.bf16.mxu0 %v4275_v2 }
  0x65   :  { %3215 = vmatpush1.bf16.msra.mxu0 %v4290_v7 }
  0x66   :  { %3217 = vmatprep.subr.bf16.mxu0 %v4296_v6 }
  0x69   :  { %3219 = vmatpush1.bf16.msra.mxu0 %v4308_v36 }
  0x6a   :  { %3221 = vmatprep.subr.bf16.mxu0 %v4314_v45 }
  0x6d   :  { %3223 = vmatpush1.bf16.msra.mxu0 %v4326_v40 }
  0x6e   :  { %3225 = vmatprep.subr.bf16.mxu0 %v4334_v37 }
  0x71   :  { %3227 = vmatpush1.bf16.msra.mxu0 %v4346_v56 }
  0x72   :  { %3229 = vmatprep.subr.bf16.mxu0 %v4352_v41 }
  0x75   :  { %3231 = vmatpush1.bf16.msra.mxu0 %v4362_v23 }
  0x76   :  { %3233 = vmatprep.subr.bf16.mxu0 %v4155_v11  ;;  %v1048_v11 = vsub.f32 %v4278_v0, %v1047_v12 }
  0x78   :  { %650 = vmatmul.mubr.f32.vlgmr.msra.gmra.mrb[0].mxu0 %v172_v10 }
  0x79   :  { %3235 = vmatpush1.bf16.msra.mxu0 %v4161_v32  ;;  %816 = vmatprep.mubr.f32.mxu0 %v4857_v15 }
  0x7a   :  { %3237 = vmatprep.subr.bf16.mxu0 %v4167_v54 }
  0x7d   :  { %3239 = vmatpush1.bf16.msra.mxu0 %v4175_v17 }
  0x7e   :  { %3241 = vmatprep.subr.bf16.mxu0 %v4181_v20 }
  0x81   :  { %3243 = vmatpush1.bf16.msra.mxu0 %v4187_v43 }
  0x82   :  { %3245 = vmatprep.subr.bf16.mxu0 %v4198_v33 }
  0x85   :  { %3247 = vmatpush1.bf16.msra.mxu0 %v4204_v5  ;;  %v1049_v5 = vand.u32 4294901760, %v1048_v11 }
  0x86   :  { %3249 = vmatprep.subr.bf16.mxu0 %v4210_v13 }
  0x89   :  { %3251 = vmatpush1.bf16.msra.mxu0 %v4216_v39 }
  0x8a   :  { %3253 = vmatprep.subr.bf16.mxu0 %v4227_v19 }
  0x8d   :  { %3255 = vmatpush1.bf16.msra.mxu0 %v4233_v18 }
  0x8e   :  { %3257 = vmatprep.subr.bf16.mxu0 %v4239_v63 }
  0x91   :  { %3259 = vmatpush1.bf16.msra.mxu0 %v4245_v8 }
  0x92   :  { %3261 = vmatprep.subr.bf16.mxu0 %v4250_v14  ;;  %v58_v14 = vld [vmem:[%s4737_s3 + $0x20] sm:$0xff] }
  0x93   :  { %v967_v1 = vand.u32 4294901760, %v58_v14 }
  0x95   :  { %3263 = vmatpush1.bf16.msra.mxu0 %v4252_v16  ;;  %v59_v16 = vld [vmem:[%s4737_s3 + $0x28] sm:$0xff]  ;;  %v1067_v21 = vsub.f32 %v58_v14, %v967_v1  ;;  %v4514_v14 = vpack.c.bf16 %v4278_v0, %v4269_v62 }
  0x96   :  { %3265 = vmatprep.subr.bf16.mxu0 %v4117_v57  ;;  %v56_v57 = vld [vmem:[%s4737_s3 + $0x10] sm:$0xff] }
  0x98   :  { %818 = vmatmul.mubr.f32.vlgmr.msra.gmra.mrb[0].mxu0 %v4109_v4 }
  0x99   :  { %3267 = vmatpush1.bf16.msra.mxu0 %v4127_v3  ;;  %920 = vmatprep.mubr.f32.mxu0 %v4857_v15  ;;  %v57_v3 = vld [vmem:[%s4737_s3 + $0x18] sm:$0xff] }
  0x9a   :  { %3269 = vmatprep.subr.bf16.mxu0 %v4135_v60  ;;  %v961_v60 = vand.u32 4294901760, %v56_v57 }
  0x9c   :  { %v4435_v54 = vsub.f32 %v56_v57, %v961_v60  ;;  %v69_v57 = vsub.s32 1, %v64_v28 }
  0x9d   :  { %3271 = vmatpush1.bf16.msra.mxu0 %v4141_v49  ;;  %v964_v49 = vand.u32 4294901760, %v57_v3 }
  0x9e   :  { %3273 = vmatprep.subr.bf16.mxu0 %v4147_v52  ;;  %v1041_v52 = vsub.f32 %v4269_v62, %v1040_v38  ;;  %v1054_v20 = vand.u32 4294901760, %v4435_v54 }
  0x9f   :  { %v4433_v32 = vpack.c.bf16 %v964_v49, %v961_v60  ;;  %v4437_v17 = vsub.f32 %v57_v3, %v964_v49  ;;  %v70_v60 = vrot.slane %v53_v50, %v69_v57 }
  0xa0   :  { %v1042_v33 = vand.u32 4294901760, %v1041_v52  ;;  %v1055_v13 = vsub.f32 %v4435_v54, %v1054_v20 }
  0xa1   :  { %3275 = vmatpush1.bf16.msra.mxu0 %v4266_v59  ;;  %v1061_v43 = vand.u32 4294901760, %v4437_v17  ;;  %3301 = vmatpush3.bf16.msra.mxu1 %v4433_v32 }
  0xa2   :  { %3277 = vmatprep.subr.bf16.mxu0 %v4275_v2  ;;  %3302 = vmatprep.subr.bf16.mxu1 %v3588_v26  ;;  %v4452_v19 = vpack.c.bf16 %v1049_v5, %v1042_v33  ;;  %v1056_v18 = vand.u32 4294901760, %v1055_v13  ;;  %v60_v2 = vld [vmem:[%s4737_s3 + $0x30] sm:$0xff] }
  0xa3   :  { %v1062_v39 = vsub.f32 %v4437_v17, %v1061_v43 }
  0xa5   :  { %3279 = vmatpush1.bf16.msra.mxu0 %v4290_v7  ;;  %v1063_v63 = vand.u32 4294901760, %v1062_v39  ;;  %v61_v7 = vld [vmem:[%s4737_s3 + $0x38] sm:$0xff] }
  0xa6   :  { %3281 = vmatprep.subr.bf16.mxu0 %v4296_v6  ;;  %v1068_v6 = vand.u32 4294901760, %v1067_v21 }
  0xa7   :  { %v4457_v8 = vpack.c.bf16 %v1063_v63, %v1056_v18 }
  0xa8   :  { %v1069_v58 = vsub.f32 %v1067_v21, %v1068_v6 }
  0xa9   :  { %3283 = vmatpush1.bf16.msra.mxu0 %v4308_v36 }
  0xaa   :  { %3285 = vmatprep.subr.bf16.mxu0 %v4314_v45  ;;  %v973_v45 = vand.u32 4294901760, %v60_v2 }
  0xac   :  { %v1081_v31 = vsub.f32 %v60_v2, %v973_v45  ;;  %v4547_v2 = vpack.c.bf16 %v1047_v12, %v1040_v38 }
  0xad   :  { %3287 = vmatpush1.bf16.msra.mxu0 %v4326_v40  ;;  %v976_v40 = vand.u32 4294901760, %v61_v7 }
  0xae   :  { %3289 = vmatprep.subr.bf16.mxu0 %v4334_v37  ;;  %v1070_v37 = vand.u32 4294901760, %v1069_v58  ;;  %v1082_v10 = vand.u32 4294901760, %v1081_v31 }
  0xaf   :  { %v1088_v47 = vsub.f32 %v61_v7, %v976_v40  ;;  %v4490_v46 = vpack.c.bf16 %v976_v40, %v973_v45  ;;  %v4555_v7 = vpack.c.bf16 %v1061_v43, %v1054_v20 }
  0xb0   :  { %v1083_v53 = vsub.f32 %v1081_v31, %v1082_v10 }
  0xb1   :  { %3291 = vmatpush1.bf16.msra.mxu0 %v4346_v56  ;;  %v1089_v24 = vand.u32 4294901760, %v1088_v47 }
  0xb2   :  { %3293 = vmatprep.subr.bf16.mxu0 %v4352_v41  ;;  %v1084_v30 = vand.u32 4294901760, %v1083_v53  ;;  %v4496_v41 = vpack.c.bf16 %v1088_v47, %v1081_v31 }
  0xb3   :  { %v1090_v9 = vsub.f32 %v1088_v47, %v1089_v24  ;;  %v4500_v22 = vpack.c.bf16 %v1089_v24, %v1082_v10 }
  0xb5   :  { %3295 = vmatpush1.bf16.msra.mxu0 %v4362_v23  ;;  %v1091_v56 = vand.u32 4294901760, %v1090_v9  ;;  %v65_v23 = vsub.s32 0, %v64_v28 }
  0xb6   :  { %3452 = vmatprep.subr.bf16.mxu0 %v3588_v26 }
  0xb7   :  { %v4478_v44 = vpack.c.bf16 %v1091_v56, %v1084_v30  ;;  %v66_v3 = vrot.slane %v53_v50, %v65_v23 }
  0xb8   :  { %922 = vmatmul.mubr.f32.vlgmr.msra.gmra.mrb[0].mxu0 %v4109_v4  ;;  %v970_v4 = vand.u32 4294901760, %v59_v16 }
  0xb9   :  { %3454 = vmatpush3.bf16.msra.mxu0 %v4452_v19  ;;  %3025 = vmatprep.mubr.msk.f32.mxu0 %vm3589_vm0, %v4857_v15 }
  0xba   :  { %3455 = vmatprep.subr.bf16.mxu0 %v3588_v26  ;;  %v1074_v59 = vsub.f32 %v59_v16, %v970_v4  ;;  %v4486_v51 = vpack.c.bf16 %v970_v4, %v967_v1  ;;  %v4520_v4 = vpack.c.bf16 %v4437_v17, %v4435_v54 }
  0xbc   :  { %v1075_v36 = vand.u32 4294901760, %v1074_v59  ;;  %3304 = vmatpush3.bf16.msra.mxu1 %v4486_v51  ;;  %v4492_v48 = vpack.c.bf16 %v1074_v59, %v1067_v21 }
  0xbd   :  { %3457 = vmatpush3.bf16.msra.mxu0 %v4457_v8  ;;  %3305 = vmatprep.subr.bf16.mxu1 %v3588_v26 }
  0xbe   :  { %3458 = vmatprep.subr.bf16.mxu0 %v3588_v26  ;;  %v1076_v61 = vsub.f32 %v1074_v59, %v1075_v36  ;;  %v4498_v42 = vpack.c.bf16 %v1075_v36, %v1068_v6 }
  0xc0   :  { %v1077_v35 = vand.u32 4294901760, %v1076_v61  ;;  %3307 = vmatpush3.bf16.msra.mxu1 %v4490_v46 }
  0xc1   :  { %3308 = vmatprep.subr.bf16.mxu1 %v3588_v26 }
  0xc2   :  { %v4474_v25 = vpack.c.bf16 %v1077_v35, %v1070_v37 }
  0xc4   :  { %3460 = vmatpush3.bf16.msra.mxu0 %v4474_v25 }
  0xc5   :  { %3461 = vmatprep.subr.bf16.mxu0 %v3588_v26 }
  0xc8   :  { %3463 = vmatpush3.bf16.msra.mxu0 %v4478_v44 }
  0xc9   :  { %3464 = vmatprep.subr.bf16.mxu0 %v3588_v26 }
 0x12e   :  { %v176_v55 = vpop.f32.mrb[0].mxu1 }
 0x12f   :  { %v178_v29 = vpop.f32.mrb[1].mxu1  ;;  %v177_v49 = vadd.f32 %v176_v55, %v66_v3 }
 0x130   :  { %v179_v52 = vadd.f32 %v178_v29, %v70_v60 }
 0x18b   :  { %v923_v11 = vpop.f32.mrb[0].mxu0 }
 0x18c   :  { %v4505_v33 = vadd.f32 %v923_v11, %v177_v49  ;;  %v925_v5 = vpop.f32.mrb[1].mxu0 }
 0x18d   :  { %v3515_v13 = vadd.f32 %v925_v5, %v179_v52 }
 0x18e   :  { %v1491_v39 = vmul.f32 %v4505_v33, %v4505_v33 }
 0x18f   :  { %v2034_v18 = vmul.f32 %v3515_v13, %v3515_v13  ;;  %944 = vrot.lane.b32.xlu0 %v3515_v13, %s3590_s24 }
 0x190   :  { %1493 = vrot.lane.b32.xlu1 %v1491_v39, %s3590_s24 }
 0x191   :  { %v2036_v63 = vsel %vm951_vm1, %v2034_v18, 0 }
 0x192   :  { %v2111_v16 = vand.u32 4294901760, %v2036_v63 }
 0x194   :  { %v2112_v1 = vsub.f32 %v2036_v63, %v2111_v16  ;;  %3026 = vmatmul.mubr.f32.vlgmr.msra.gmra.mrb[2].mxu0 %v2111_v16  ;;  %929 = vrot.lane.b32.xlu1 %v4505_v33, %s3591_s2 }
 0x195   :  { %3466 = vmatpush3.bf16.msra.mxu0 %v4514_v14  ;;  %3044 = vmatprep.mubr.msk.f32.mxu0 %vm3589_vm0, %v4857_v15 }
 0x196   :  { %3467 = vmatprep.subr.bf16.mxu0 %v3588_v26  ;;  %v2113_v21 = vand.u32 4294901760, %v2112_v1 }
 0x198   :  { %937 = vrot.lane.b32.xlu1 %v4505_v33, %s3592_s25  ;;  %v4526_v59 = vsub.f32 %v2112_v1, %v2113_v21 }
 0x199   :  { %3469 = vmatpush3.bf16.msra.mxu0 %v4520_v4 }
 0x19a   :  { %3470 = vmatprep.subr.bf16.mxu0 %v3588_v26 }
 0x19d   :  { %3472 = vmatpush3.bf16.msra.mxu0 %v4492_v48 }
 0x19e   :  { %3473 = vmatprep.subr.bf16.mxu0 %v3588_v26 }
 0x1a1   :  { %3475 = vmatpush3.bf16.msra.mxu0 %v4496_v41 }
 0x1a2   :  { %3476 = vmatprep.subr.bf16.mxu0 %v3588_v26 }
 0x1a4   :  { %3045 = vmatmul.mubr.f32.vlgmr.msra.gmra.mrb[2].mxu0 %v2112_v1 }
 0x1a5   :  { %3478 = vmatpush3.bf16.msra.mxu0 %v4367_v27  ;;  %3063 = vmatprep.mubr.msk.f32.mxu0 %vm3589_vm0, %v4857_v15 }
 0x1a6   :  { %3479 = vmatprep.subr.bf16.mxu0 %v3588_v26 }
 0x1a9   :  { %3481 = vmatpush3.bf16.msra.mxu0 %v4433_v32 }
 0x1aa   :  { %3482 = vmatprep.subr.bf16.mxu0 %v3588_v26 }
 0x1ad   :  { %3484 = vmatpush3.bf16.msra.mxu0 %v4486_v51 }
 0x1ae   :  { %3485 = vmatprep.subr.bf16.mxu0 %v3588_v26 }
 0x1b1   :  { %3487 = vmatpush3.bf16.msra.mxu0 %v4490_v46 }
 0x1b2   :  { %3488 = vmatprep.subr.bf16.mxu0 %v3588_v26 }
 0x1b4   :  { %3064 = vmatmul.mubr.f32.vlgmr.msra.gmra.mrb[2].mxu0 %v2113_v21 }
 0x1b5   :  { %3490 = vmatpush3.bf16.msra.mxu0 %v4547_v2  ;;  %3082 = vmatprep.mubr.msk.f32.mxu0 %vm3589_vm0, %v4857_v15 }
 0x1b6   :  { %3491 = vmatprep.subr.bf16.mxu0 %v3588_v26 }
 0x1b9   :  { %3493 = vmatpush3.bf16.msra.mxu0 %v4555_v7 }
 0x1ba   :  { %3494 = vmatprep.subr.bf16.mxu0 %v3588_v26 }
 0x1bd   :  { %3496 = vmatpush3.bf16.msra.mxu0 %v4498_v42 }
 0x1be   :  { %3497 = vmatprep.subr.bf16.mxu0 %v3588_v26 }
 0x1c1   :  { %3499 = vmatpush3.bf16.msra.mxu0 %v4500_v22 }
 0x1c2   :  { %3500 = vmatprep.subr.bf16.mxu0 %v3588_v26 }
 0x1c4   :  { %3083 = vmatmul.mubr.f32.vlgmr.msra.gmra.mrb[2].mxu0 %v2111_v16 }
 0x1c5   :  { %3502 = vmatpush3.bf16.msra.mxu0 %v4367_v27  ;;  %3101 = vmatprep.mubr.msk.f32.mxu0 %vm3589_vm0, %v4857_v15 }
 0x1c6   :  { %3503 = vmatprep.subr.bf16.mxu0 %v3588_v26 }
 0x1c9   :  { %3505 = vmatpush3.bf16.msra.mxu0 %v4433_v32 }
 0x1ca   :  { %3506 = vmatprep.subr.bf16.mxu0 %v3588_v26 }
 0x1cd   :  { %3508 = vmatpush3.bf16.msra.mxu0 %v4486_v51 }
 0x1ce   :  { %3509 = vmatprep.subr.bf16.mxu0 %v3588_v26 }
 0x1d1   :  { %3511 = vmatpush3.bf16.msra.mxu0 %v4490_v46 }
 0x1d4   :  { %3102 = vmatmul.mubr.f32.vlgmr.msra.gmra.mrb[2].mxu0 %v2111_v16 }
 0x201   :  { %v945_v62 = vpop.permute.xlu0 %944 }
 0x202   :  { %v947_v0 = vmul.f32 %v4505_v33, %v945_v62  ;;  %v4578_v38 = vpop.permute.xlu1 %1493 }
 0x203   :  { %v1495_v10 = vsel %vm951_vm1, %v4578_v38, 0 }
 0x204   :  { %949 = vrot.lane.b32.xlu0 %v947_v0, %s3590_s24  ;;  %v4640_v24 = vand.u32 4294901760, %v1495_v10 }
 0x206   :  { %v930_v12 = vpop.permute.xlu1 %929  ;;  %v1571_v53 = vsub.f32 %v1495_v10, %v4640_v24 }
 0x207   :  { %v932_v43 = vmax.f32 %v4505_v33, %v930_v12 }
 0x208   :  { %933 = vrot.lane.b32.xlu0 %v4505_v33, %s3593_s26  ;;  %v1572_v9 = vand.u32 4294901760, %v1571_v53 }
 0x20a   :  { %v938_v40 = vpop.permute.xlu1 %937  ;;  %v1573_v30 = vsub.f32 %v1571_v53, %v1572_v9 }
 0x20c   :  { %v1574_v56 = vand.u32 4294901760, %v1573_v30 }
 0x276   :  { %v950_v54 = vpop.permute.xlu0 %949 }
 0x277   :  { %v952_v17 = vsel %vm951_vm1, %v950_v54, 0 }
 0x278   :  { %v4581_v20 = vand.u32 4294901760, %v952_v17 }
 0x27a   :  { %v1028_v6 = vsub.f32 %v952_v17, %v4581_v20  ;;  %v934_v36 = vpop.permute.xlu0 %933 }
 0x27b   :  { %v936_v45 = vmax.f32 %v932_v43, %v934_v36 }
 0x27c   :  { %v1029_v58 = vand.u32 4294901760, %v1028_v6 }
 0x27d   :  { %v940_v61 = vmax.f32 %v936_v45, %v938_v40 }
 0x27e   :  { %v1030_v31 = vsub.f32 %v1028_v6, %v1029_v58 }
 0x27f   :  { %942 = vst.msk [vmem:[#allocation2] sm:$0xff] %vm941_vm2, %v940_v61 }
 0x280   :  { %v1031_v47 = vand.u32 4294901760, %v1030_v31 }
 0x282   :  { %2779 = vmatmul.mubr.f32.vlgmr.msra.gmra.mrb[2].mxu1 %v1031_v47 }
 0x283   :  { %3310 = vmatpush3.bf16.msra.mxu1 %v4452_v19  ;;  %2797 = vmatprep.mubr.msk.f32.mxu1 %vm3589_vm0, %v4857_v15 }
 0x284   :  { %3311 = vmatprep.subr.bf16.mxu1 %v3588_v26 }
 0x287   :  { %3313 = vmatpush3.bf16.msra.mxu1 %v4457_v8 }
 0x288   :  { %3314 = vmatprep.subr.bf16.mxu1 %v3588_v26 }
 0x28b   :  { %3316 = vmatpush3.bf16.msra.mxu1 %v4474_v25 }
 0x28c   :  { %3317 = vmatprep.subr.bf16.mxu1 %v3588_v26 }
 0x28f   :  { %3319 = vmatpush3.bf16.msra.mxu1 %v4478_v44 }
 0x290   :  { %3320 = vmatprep.subr.bf16.mxu1 %v3588_v26 }
 0x292   :  { %2798 = vmatmul.mubr.f32.vlgmr.msra.gmra.mrb[2].mxu1 %v4581_v20 }
 0x293   :  { %3322 = vmatpush3.bf16.msra.mxu1 %v4514_v14  ;;  %2816 = vmatprep.mubr.msk.f32.mxu1 %vm3589_vm0, %v4857_v15 }
 0x294   :  { %3323 = vmatprep.subr.bf16.mxu1 %v3588_v26 }
 0x297   :  { %3325 = vmatpush3.bf16.msra.mxu1 %v4520_v4 }
 0x298   :  { %3326 = vmatprep.subr.bf16.mxu1 %v3588_v26 }
 0x29b   :  { %3328 = vmatpush3.bf16.msra.mxu1 %v4492_v48 }
 0x29c   :  { %3329 = vmatprep.subr.bf16.mxu1 %v3588_v26 }
 0x29f   :  { %3331 = vmatpush3.bf16.msra.mxu1 %v4496_v41 }
 0x2a0   :  { %3332 = vmatprep.subr.bf16.mxu1 %v3588_v26 }
 0x2a2   :  { %2817 = vmatmul.mubr.f32.vlgmr.msra.gmra.mrb[2].mxu1 %v1028_v6 }
 0x2a3   :  { %3334 = vmatpush3.bf16.msra.mxu1 %v4367_v27  ;;  %2835 = vmatprep.mubr.msk.f32.mxu1 %vm3589_vm0, %v4857_v15 }
 0x2a4   :  { %3335 = vmatprep.subr.bf16.mxu1 %v3588_v26 }
 0x2a7   :  { %3337 = vmatpush3.bf16.msra.mxu1 %v4433_v32  ;;  %v4611_v37 = vpop.f32.mrb[2].mxu0 }
 0x2a8   :  { %v3103_v35 = vpop.f32.mrb[3].mxu0  ;;  %3338 = vmatprep.subr.bf16.mxu1 %v3588_v26 }
 0x2ab   :  { %3340 = vmatpush3.bf16.msra.mxu1 %v4486_v51 }
 0x2ac   :  { %3341 = vmatprep.subr.bf16.mxu1 %v3588_v26 }
 0x2af   :  { %3343 = vmatpush3.bf16.msra.mxu1 %v4490_v46 }
 0x2b0   :  { %3344 = vmatprep.subr.bf16.mxu1 %v3588_v26 }
 0x2b2   :  { %2836 = vmatmul.mubr.f32.vlgmr.msra.gmra.mrb[2].mxu1 %v1029_v58 }
 0x2b3   :  { %3346 = vmatpush3.bf16.msra.mxu1 %v4547_v2  ;;  %2854 = vmatprep.mubr.msk.f32.mxu1 %vm3589_vm0, %v4857_v15 }
 0x2b4   :  { %3347 = vmatprep.subr.bf16.mxu1 %v3588_v26 }
 0x2b7   :  { %3349 = vmatpush3.bf16.msra.mxu1 %v4555_v7 }
 0x2b8   :  { %3350 = vmatprep.subr.bf16.mxu1 %v3588_v26 }
 0x2bb   :  { %3352 = vmatpush3.bf16.msra.mxu1 %v4498_v42 }
 0x2bc   :  { %3353 = vmatprep.subr.bf16.mxu1 %v3588_v26 }
 0x2bf   :  { %3355 = vmatpush3.bf16.msra.mxu1 %v4500_v22 }
 0x2c0   :  { %3356 = vmatprep.subr.bf16.mxu1 %v3588_v26 }
 0x2c2   :  { %2855 = vmatmul.mubr.f32.vlgmr.msra.gmra.mrb[2].mxu1 %v4581_v20 }
 0x2c3   :  { %3358 = vmatpush3.bf16.msra.mxu1 %v4367_v27  ;;  %2873 = vmatprep.mubr.msk.f32.mxu1 %vm3589_vm0, %v4857_v15 }
 0x2c4   :  { %3359 = vmatprep.subr.bf16.mxu1 %v3588_v26 }
 0x2c7   :  { %3361 = vmatpush3.bf16.msra.mxu1 %v4433_v32 }
 0x2c8   :  { %3362 = vmatprep.subr.bf16.mxu1 %v3588_v26 }
 0x2cb   :  { %3364 = vmatpush3.bf16.msra.mxu1 %v4486_v51 }
 0x2cc   :  { %3365 = vmatprep.subr.bf16.mxu1 %v3588_v26 }
 0x2cf   :  { %3367 = vmatpush3.bf16.msra.mxu1 %v4490_v46 }
 0x2d0   :  { %3368 = vmatprep.subr.bf16.mxu1 %v3588_v26 }
 0x2d2   :  { %2874 = vmatmul.mubr.f32.vlgmr.msra.gmra.mrb[2].mxu1 %v4581_v20 }
 0x2d3   :  { %3370 = vmatpush3.bf16.msra.mxu1 %v4367_v27  ;;  %2892 = vmatprep.mubr.msk.f32.mxu1 %vm3589_vm0, %v4857_v15 }
 0x2d4   :  { %3371 = vmatprep.subr.bf16.mxu1 %v3588_v26 }
 0x2d7   :  { %3373 = vmatpush3.bf16.msra.mxu1 %v4433_v32 }
 0x2d8   :  { %3374 = vmatprep.subr.bf16.mxu1 %v3588_v26 }
 0x2db   :  { %3376 = vmatpush3.bf16.msra.mxu1 %v4486_v51 }
 0x2dc   :  { %3377 = vmatprep.subr.bf16.mxu1 %v3588_v26 }
 0x2df   :  { %3379 = vmatpush3.bf16.msra.mxu1 %v4490_v46 }
 0x2e0   :  { %3380 = vmatprep.subr.bf16.mxu1 %v3588_v26 }
 0x2e2   :  { %2893 = vmatmul.mubr.f32.vlgmr.msra.gmra.mrb[4].mxu1 %v1574_v56 }
 0x2e3   :  { %3382 = vmatpush3.bf16.msra.mxu1 %v4452_v19  ;;  %2911 = vmatprep.mubr.msk.f32.mxu1 %vm3589_vm0, %v4857_v15  ;;  %v2115_v19 = vand.u32 4294901760, %v4526_v59 }
 0x2e4   :  { %3383 = vmatprep.subr.bf16.mxu1 %v3588_v26 }
 0x2e7   :  { %3385 = vmatpush3.bf16.msra.mxu1 %v4457_v8 }
 0x2e8   :  { %3386 = vmatprep.subr.bf16.mxu1 %v3588_v26 }
 0x2eb   :  { %3388 = vmatpush3.bf16.msra.mxu1 %v4474_v25 }
 0x2ec   :  { %3389 = vmatprep.subr.bf16.mxu1 %v3588_v26 }
 0x2ef   :  { %3391 = vmatpush3.bf16.msra.mxu1 %v4478_v44 }
 0x2f0   :  { %3392 = vmatprep.subr.bf16.mxu1 %v3588_v26 }
 0x2f2   :  { %2912 = vmatmul.mubr.f32.vlgmr.msra.gmra.mrb[4].mxu1 %v4640_v24 }
 0x2f3   :  { %3394 = vmatpush3.bf16.msra.mxu1 %v4514_v14  ;;  %2930 = vmatprep.mubr.msk.f32.mxu1 %vm3589_vm0, %v4857_v15 }
 0x2f4   :  { %3395 = vmatprep.subr.bf16.mxu1 %v3588_v26 }
 0x2f7   :  { %3397 = vmatpush3.bf16.msra.mxu1 %v4520_v4 }
 0x2f8   :  { %3398 = vmatprep.subr.bf16.mxu1 %v3588_v26 }
 0x2fb   :  { %3400 = vmatpush3.bf16.msra.mxu1 %v4492_v48 }
 0x2fc   :  { %3401 = vmatprep.subr.bf16.mxu1 %v3588_v26 }
 0x2ff   :  { %3403 = vmatpush3.bf16.msra.mxu1 %v4496_v41 }
 0x300   :  { %3404 = vmatprep.subr.bf16.mxu1 %v3588_v26 }
 0x302   :  { %2931 = vmatmul.mubr.f32.vlgmr.msra.gmra.mrb[4].mxu1 %v1571_v53 }
 0x303   :  { %3406 = vmatpush3.bf16.msra.mxu1 %v4367_v27  ;;  %2949 = vmatprep.mubr.msk.f32.mxu1 %vm3589_vm0, %v4857_v15 }
 0x304   :  { %3407 = vmatprep.subr.bf16.mxu1 %v3588_v26 }
 0x307   :  { %3409 = vmatpush3.bf16.msra.mxu1 %v4433_v32 }
 0x308   :  { %3410 = vmatprep.subr.bf16.mxu1 %v3588_v26 }
 0x30b   :  { %3412 = vmatpush3.bf16.msra.mxu1 %v4486_v51 }
 0x30c   :  { %3413 = vmatprep.subr.bf16.mxu1 %v3588_v26 }
 0x30f   :  { %3415 = vmatpush3.bf16.msra.mxu1 %v4490_v46 }
 0x310   :  { %3416 = vmatprep.subr.bf16.mxu1 %v3588_v26 }
 0x312   :  { %2950 = vmatmul.mubr.f32.vlgmr.msra.gmra.mrb[4].mxu1 %v1572_v9 }
 0x313   :  { %3418 = vmatpush3.bf16.msra.mxu1 %v4547_v2  ;;  %2968 = vmatprep.mubr.msk.f32.mxu1 %vm3589_vm0, %v4857_v15 }
 0x314   :  { %3419 = vmatprep.subr.bf16.mxu1 %v3588_v26 }
 0x317   :  { %3421 = vmatpush3.bf16.msra.mxu1 %v4555_v7 }
 0x318   :  { %3422 = vmatprep.subr.bf16.mxu1 %v3588_v26 }
 0x31b   :  { %3424 = vmatpush3.bf16.msra.mxu1 %v4498_v42 }
 0x31c   :  { %3425 = vmatprep.subr.bf16.mxu1 %v3588_v26 }
 0x31f   :  { %3427 = vmatpush3.bf16.msra.mxu1 %v4500_v22 }
 0x320   :  { %3428 = vmatprep.subr.bf16.mxu1 %v3588_v26 }
 0x322   :  { %2969 = vmatmul.mubr.f32.vlgmr.msra.gmra.mrb[4].mxu1 %v4640_v24 }
 0x323   :  { %3430 = vmatpush3.bf16.msra.mxu1 %v4367_v27  ;;  %2987 = vmatprep.mubr.msk.f32.mxu1 %vm3589_vm0, %v4857_v15 }
 0x324   :  { %3431 = vmatprep.subr.bf16.mxu1 %v3588_v26 }
 0x327   :  { %3433 = vmatpush3.bf16.msra.mxu1 %v4433_v32 }
 0x328   :  { %3434 = vmatprep.subr.bf16.mxu1 %v3588_v26 }
 0x32b   :  { %3436 = vmatpush3.bf16.msra.mxu1 %v4486_v51 }
 0x32c   :  { %3437 = vmatprep.subr.bf16.mxu1 %v3588_v26 }
 0x32f   :  { %3439 = vmatpush3.bf16.msra.mxu1 %v4490_v46 }
 0x330   :  { %3440 = vmatprep.subr.bf16.mxu1 %v3588_v26 }
 0x332   :  { %2988 = vmatmul.mubr.f32.vlgmr.msra.gmra.mrb[4].mxu1 %v4640_v24 }
 0x333   :  { %3442 = vmatpush3.bf16.msra.mxu1 %v4367_v27  ;;  %3006 = vmatprep.mubr.msk.f32.mxu1 %vm3589_vm0, %v4857_v15 }
 0x334   :  { %3443 = vmatprep.subr.bf16.mxu1 %v3588_v26 }
 0x337   :  { %3445 = vmatpush3.bf16.msra.mxu1 %v4433_v32 }
 0x338   :  { %3446 = vmatprep.subr.bf16.mxu1 %v3588_v26 }
 0x33b   :  { %3448 = vmatpush3.bf16.msra.mxu1 %v4486_v51 }
 0x33c   :  { %3449 = vmatprep.subr.bf16.mxu1 %v3588_v26 }
 0x33f   :  { %3451 = vmatpush3.bf16.msra.mxu1 %v4490_v46 }
 0x342   :  { %3007 = vmatmul.mubr.f32.vlgmr.msra.gmra.mrb[6].mxu1 %v2115_v19 }
 0x3a5   :  { %v1487_v8 = vpop.f32.mrb[2].mxu1 }
 0x3a6   :  { %v2875_v27 = vpop.f32.mrb[3].mxu1 }
 0x3a7   :  { %3574 = shalt.err (!%p3571_p4)
}
 0x3a8   :  { %s3575_s1 = scalar_lea.hbm %s4738_s4, 128 }
 0x3a9   :  { %p3576_p5 = scmp.ne.s32.totalorder %s4738_s4, %s3575_s1  ;;  %p3579_p6 = scmp.lt.u32.totalorder %s3575_s1, %s4738_s4 }
 0x3ab   :  { %p3581_p7 = pnand %p3579_p6, %p3576_p5 }
 0x3ad   :  { %3584 = shalt.err (!%p3581_p7)
}
 0x3ae   :  { %2591 = dma.vmem_to_hbm [thread:$0]  %s2589_s28, 128, %s4738_s4, [#allocation3]   ;;  %vm2580_vm3 = vcmask 31744  }
 0x405   :  { %v2030_v15 = vpop.f32.mrb[4].mxu1 }
 0x406   :  { %v2989_v26 = vpop.f32.mrb[5].mxu1  ;;  %v2575_v51 = vmax.f32 %v2030_v15, 1e-16 }
 0x415   :  { %v2117_v32 = vpop.f32.mrb[6].mxu1 }
 0x416   :  { %v3516_v25 = vadd.f32 %v4611_v37, %v2117_v32  ;;  %v3008_v44 = vpop.f32.mrb[7].mxu1 }
 0x418   :  { %v2576_v46 = vmax.f32 %v3516_v25, 1e-16 }
 0x41a   :  { %v2577_v48 = vmul.f32 %v2576_v46, %v2575_v51 }
 0x41c   :  { %3561 = vrsqrt.f32 %v2577_v48 }
 0x426   :  { %v3562_v41 = vpop.eup %3561 }
 0x427   :  { %v2579_v55 = vmul.f32 %v3562_v41, %v1487_v8 }
 0x429   :  { %2581 = vst.msk [vmem:[%s4739_s5] sm:$0xff] %vm2580_vm3, %v2579_v55 }
 0x42a   :  { %3585 = dma.done.wait [#allocation3], 128  }
 0x42b   :  { %3586 = vsyncadd [#allocation3], 4294967168 }
 0x42c   :  { %2599 = vsyncpa [#allocation3], 1 }

</bundles_post_ra>
